<compile_context>
chip_gen: v6e
topology: v6e:2x2x1
jax: 0.10.0
libtpu: 0.0.40
codegen_flags: <defaults>
</compile_context>

<pallas_src>
import math

import jax
import jax.numpy as jnp
from jax import lax
from jax.experimental import pallas as pl
from jax.experimental.pallas import tpu as pltpu


def _round_up(x, m):
    return (x + m - 1) // m * m


def _swish(z):
    return z * jax.nn.sigmoid(z)


def _vmem_cap_bytes():
    """Per-core VMEM capacity (falls back to the smallest, v7x, if unknown)."""
    try:
        info = pltpu.get_tpu_info()
        cap = getattr(info, "vmem_capacity_bytes", None)
        if cap:
            return int(cap)
    except Exception:
        pass
    return 64 * 1024 * 1024


# ---------------------------------------------------------------------------
# Stage 1: fused projections (u, v, qk) + OffsetScale (1/sqrt(d_k) pre-folded).
# ---------------------------------------------------------------------------
def _make_proj_kernel(Hp, Dp, mxu_dtype):
    def kernel(x_ref, w_ref, b_ref, sc_ref, q_ref, k_ref, u_ref, v_ref):
        x = x_ref[0].astype(mxu_dtype)                        # (t1, F)
        p = jnp.dot(x, w_ref[...], preferred_element_type=jnp.float32)
        p = _swish(p + b_ref[...])                            # (t1, 2*Hp+Dp)

        u = p[:, :Hp]
        v = p[:, Hp:2 * Hp]
        qk = p[:, 2 * Hp:2 * Hp + Dp]

        gq, bq = sc_ref[0:1, :], sc_ref[1:2, :]               # scale folded in
        gk, bk = sc_ref[2:3, :], sc_ref[3:4, :]
        q_ref[0] = (qk * gq + bq).astype(q_ref.dtype)
        k_ref[0] = (qk * gk + bk).astype(k_ref.dtype)
        u_ref[0] = u.astype(u_ref.dtype)
        v_ref[0] = v.astype(v_ref.dtype)

    return kernel


# ---------------------------------------------------------------------------
# Stage 2: flash attention + gating + output projection.
# ---------------------------------------------------------------------------
def _make_attn_kernel(mxu_dtype, with_kbias, approx_recip):
    def kernel(*refs):
        if with_kbias:
            (q_ref, k_ref, v_ref, u_ref, kb_ref,
             wo_ref, bo_ref, o_ref, m_sc, l_sc, acc_sc) = refs
        else:
            (q_ref, k_ref, v_ref, u_ref,
             wo_ref, bo_ref, o_ref, m_sc, l_sc, acc_sc) = refs
            kb_ref = None

        ki = pl.program_id(2)

        @pl.when(ki == 0)
        def _():
            m_sc[...] = jnp.full_like(m_sc, -jnp.inf)
            l_sc[...] = jnp.zeros_like(l_sc)
            acc_sc[...] = jnp.zeros_like(acc_sc)

        q = q_ref[0]                                          # (tq, Dp)
        k = k_ref[0]                                          # (tk, Dp)
        # contract last dims directly -> no explicit k transpose
        s = lax.dot_general(q, k,
                            dimension_numbers=(((1,), (1,)), ((), ())),
                            preferred_element_type=jnp.float32)   # (tq, tk)
        if kb_ref is not None:
            # additive key-padding bias: 0 for real keys, -1e30 for padded ones
            s = s + kb_ref[...]

        m_prev = m_sc[...]
        m_new = jnp.maximum(m_prev, jnp.max(s, axis=-1, keepdims=True))
        alpha = jnp.exp(m_prev - m_new)
        p = jnp.exp(s - m_new)
        l_sc[...] = alpha * l_sc[...] + jnp.sum(p, axis=-1, keepdims=True)
        acc_sc[...] = alpha * acc_sc[...] + jnp.dot(
            p.astype(mxu_dtype), v_ref[0], preferred_element_type=jnp.float32)
        m_sc[...] = m_new

        @pl.when(ki == pl.num_programs(2) - 1)
        def _():
            ctx = acc_sc[...] * pl.reciprocal(l_sc[...], approx=approx_recip)
            gated = (u_ref[0] * ctx).astype(mxu_dtype)        # u stored bf16
            out = jnp.dot(gated, wo_ref[...],
                          preferred_element_type=jnp.float32) + bo_ref[...]
            o_ref[0] = out.astype(o_ref.dtype)

    return kernel


# ---------------------------------------------------------------------------
# Tile / VMEM budgeting
# ---------------------------------------------------------------------------
def _choose_tiles(T, B):
    """Returns (T_pad, t1, tq, tk)."""
    if T <= 512:
        t = _round_up(T, 8)
        return t, t, t, t
    T_pad = _round_up(T, 512)
    t1, tq, tk = 512, 512, 512
    # v7x megacore balance: keep the parallel extent (B * n_query_tiles) even.
    if (B * (T_pad // tq)) % 2 == 1:
        tq = 256
    return T_pad, t1, tq, tk


def _maybe_halve(t, T_pad, floor=256):
    h = t // 2
    if t > floor and h >= 8 and h % 8 == 0 and T_pad % h == 0:
        return h, True
    return t, False


def _stage1_vmem_bytes(t1, F, Np, Hp, Dp, mb):
    b = 2 * t1 * F * 4                              # x blocks (f32, dbl-buf)
    b += F * Np * mb + 8 * Np * 4 + 8 * Dp * 4      # fused W/b/scales (single)
    b += 2 * t1 * Dp * mb * 2                       # q, k outputs
    b += 2 * t1 * Hp * mb * 2                       # u, v outputs
    return b


def _stage2_vmem_bytes(tq, tk, Dp, Hp, Fp, mb, ob, with_kbias):
    b = 2 * tq * Dp * mb + 2 * tk * Dp * mb         # q, k
    b += 2 * tk * Hp * mb + 2 * tq * Hp * mb        # v, u
    b += Hp * Fp * mb + 8 * Fp * 4                  # Wo, bo (single copy)
    b += 2 * tq * Fp * ob                           # output blocks
    b += 2 * tq * 128 * 4 + tq * Hp * 4             # m, l, acc scratch
    if with_kbias:
        b += 2 * 8 * tk * 4
    return b


def _vmem_limit(footprint, cap):
    return int(min(max(footprint * 1.25 + (2 << 20), 24 << 20), cap * 0.9))


# ---------------------------------------------------------------------------
# One-time parameter packing (hoisted out of the forward path)
# ---------------------------------------------------------------------------
def prepare_gau_params(params, d_k, *, mxu_dtype=jnp.bfloat16):
    F, H = params["w_gate"].shape
    Hp = _round_up(H, 128)
    Dp = _round_up(d_k, 128)
    Fp = _round_up(F, 128)
    Np = 2 * Hp + Dp
    f32 = jnp.float32
    inv_scale = 1.0 / math.sqrt(d_k)

    w_fused = jnp.zeros((F, Np), f32)
    w_fused = w_fused.at[:, :H].set(params["w_gate"])
    w_fused = w_fused.at[:, Hp:Hp + H].set(params["w_v"])
    w_fused = w_fused.at[:, 2 * Hp:2 * Hp + d_k].set(params["w_qk"])
    w_fused = w_fused.astype(mxu_dtype)

    b_fused = jnp.zeros((1, Np), f32)
    b_fused = b_fused.at[:, :H].set(params["b_gate"].reshape(1, -1))
    b_fused = b_fused.at[:, Hp:Hp + H].set(params["b_v"].reshape(1, -1))
    b_fused = b_fused.at[:, 2 * Hp:2 * Hp + d_k].set(params["b_qk"].reshape(1, -1))

    # 1/sqrt(d_k) folded into the q offset-scale here (not in-kernel).
    scales = jnp.zeros((4, Dp), f32)
    scales = scales.at[0, :d_k].set(params["gamma_q"][0] * inv_scale)
    scales = scales.at[1, :d_k].set(params["beta_q"][0] * inv_scale)
    scales = scales.at[2, :d_k].set(params["gamma_k"][0])
    scales = scales.at[3, :d_k].set(params["beta_k"][0])

    w_out = jnp.zeros((Hp, Fp), f32).at[:H, :F].set(params["w_out"])
    w_out = w_out.astype(mxu_dtype)
    b_out = jnp.zeros((1, Fp), f32).at[:, :F].set(params["b_out"].reshape(1, -1))

    return {"w_fused": w_fused, "b_fused": b_fused, "scales": scales,
            "w_out": w_out, "b_out": b_out, "n_feat": F}


# ---------------------------------------------------------------------------
# Forward
# ---------------------------------------------------------------------------
def gau_forward(x, packed, *, approx_recip=True):
    """x: (B, T, n_feat) float32.  packed: output of prepare_gau_params."""
    B, T, F = x.shape
    w_fused = packed["w_fused"]
    b_fused = packed["b_fused"]
    scales = packed["scales"]
    w_out = packed["w_out"]
    b_out = packed["b_out"]
    assert w_fused.shape[0] == F, "x feature dim does not match packed params"

    mxu_dtype = w_fused.dtype
    mb = jnp.dtype(mxu_dtype).itemsize
    ob = jnp.dtype(x.dtype).itemsize
    Np = w_fused.shape[1]
    Dp = scales.shape[1]
    Hp = w_out.shape[0]
    Fp = w_out.shape[1]

    # ---- tile selection + VMEM budgeting (v7x-aware via get_tpu_info) ----
    T_pad, t1, tq, tk = _choose_tiles(T, B)
    vmem_cap = _vmem_cap_bytes()
    target = int(vmem_cap * 0.70)

    for _ in range(8):
        if _stage2_vmem_bytes(tq, tk, Dp, Hp, Fp, mb, ob, True) <= target:
            break
        if tq >= tk:
            tq, changed = _maybe_halve(tq, T_pad)
            if not changed:
                tk, changed = _maybe_halve(tk, T_pad)
        else:
            tk, changed = _maybe_halve(tk, T_pad)
            if not changed:
                tq, changed = _maybe_halve(tq, T_pad)
        if not changed:
            break
    for _ in range(4):
        if _stage1_vmem_bytes(t1, F, Np, Hp, Dp, mb) <= target:
            break
        t1, changed = _maybe_halve(t1, T_pad)
        if not changed:
            break

    n_t1 = T_pad // t1
    n_tq = T_pad // tq
    n_tk = T_pad // tk

    vmem1 = _vmem_limit(_stage1_vmem_bytes(t1, F, Np, Hp, Dp, mb), vmem_cap)
    vmem2 = _vmem_limit(
        _stage2_vmem_bytes(tq, tk, Dp, Hp, Fp, mb, ob, T_pad != T), vmem_cap)

    # ---- pad activation along T only when actually needed ----
    if T_pad != T:
        x_p = jnp.zeros((B, T_pad, F), x.dtype).at[:, :T, :].set(x)
    else:
        x_p = x

    const_vmem = pl.BlockSpec(memory_space=pltpu.MemorySpace.VMEM)

    # ---- stage 1: fused projections ----
    q, k, u, v = pl.pallas_call(
        _make_proj_kernel(Hp, Dp, mxu_dtype),
        out_shape=(
            jax.ShapeDtypeStruct((B, T_pad, Dp), mxu_dtype),    # q (scaled)
            jax.ShapeDtypeStruct((B, T_pad, Dp), mxu_dtype),    # k
            jax.ShapeDtypeStruct((B, T_pad, Hp), mxu_dtype),    # u (gate, bf16)
            jax.ShapeDtypeStruct((B, T_pad, Hp), mxu_dtype),    # v
        ),
        grid=(B, n_t1),
        in_specs=[
            pl.BlockSpec((1, t1, F), lambda b, i: (b, i, 0)),   # F un-padded
            const_vmem,                                         # fused weight
            const_vmem,                                         # fused bias
            const_vmem,                                         # offset-scales
        ],
        out_specs=(
            pl.BlockSpec((1, t1, Dp), lambda b, i: (b, i, 0)),
            pl.BlockSpec((1, t1, Dp), lambda b, i: (b, i, 0)),
            pl.BlockSpec((1, t1, Hp), lambda b, i: (b, i, 0)),
            pl.BlockSpec((1, t1, Hp), lambda b, i: (b, i, 0)),
        ),
        compiler_params=pltpu.CompilerParams(
            dimension_semantics=("parallel", "parallel"),
            vmem_limit_bytes=vmem1),
    )(x_p, w_fused, b_fused, scales)

    # ---- stage 2: flash attention + gate + output projection ----
    mask_needed = (T_pad != T)
    attn_inputs = [q, k, v, u]
    in_specs = [
        pl.BlockSpec((1, tq, Dp), lambda b, qi, ki: (b, qi, 0)),    # q
        pl.BlockSpec((1, tk, Dp), lambda b, qi, ki: (b, ki, 0)),    # k
        pl.BlockSpec((1, tk, Hp), lambda b, qi, ki: (b, ki, 0)),    # v
        pl.BlockSpec((1, tq, Hp), lambda b, qi, ki: (b, qi, 0)),    # u
    ]
    if mask_needed:
        kpos = lax.broadcasted_iota(jnp.int32, (1, T_pad), 1)
        kbias = jnp.where(kpos < T, 0.0, -1e30).astype(jnp.float32)
        attn_inputs.append(kbias)
        in_specs.append(pl.BlockSpec((1, tk), lambda b, qi, ki: (0, ki)))
    attn_inputs += [w_out, b_out]
    in_specs += [const_vmem, const_vmem]                            # Wo, bo

    out_p = pl.pallas_call(
        _make_attn_kernel(mxu_dtype, mask_needed, approx_recip),
        out_shape=jax.ShapeDtypeStruct((B, T_pad, Fp), x.dtype),
        grid=(B, n_tq, n_tk),
        in_specs=in_specs,
        out_specs=pl.BlockSpec((1, tq, Fp), lambda b, qi, ki: (b, qi, 0)),
        scratch_shapes=[
            pltpu.VMEM((tq, 1), jnp.float32),       # running max
            pltpu.VMEM((tq, 1), jnp.float32),       # running sum
            pltpu.VMEM((tq, Hp), jnp.float32),      # context accumulator
        ],
        compiler_params=pltpu.CompilerParams(
            dimension_semantics=("parallel", "parallel", "arbitrary"),
            vmem_limit_bytes=vmem2),
    )(*attn_inputs)

    return out_p[:, :T, :F]


def gau_forward_raw(x, params, d_k, *, mxu_dtype=jnp.bfloat16, **kw):
    """Convenience: pack (un-cached) + forward."""
    return gau_forward(x, prepare_gau_params(params, d_k, mxu_dtype=mxu_dtype), **kw)


# ---------------------------------------------------------------------------
# Plain-JAX reference & params
# ---------------------------------------------------------------------------
def gau_reference(x, p, d_k):
    swish = lambda z: z * jax.nn.sigmoid(z)
    u = swish(x @ p["w_gate"] + p["b_gate"])
    v = swish(x @ p["w_v"] + p["b_v"])
    qk = swish(x @ p["w_qk"] + p["b_qk"])
    q = qk * p["gamma_q"] + p["beta_q"]
    k = qk * p["gamma_k"] + p["beta_k"]
    scores = jnp.einsum("btd,bsd->bts", q, k) / math.sqrt(d_k)
    attn = jax.nn.softmax(scores, axis=-1)
    ctx = jnp.einsum("bts,bsh->bth", attn, v)
    return (u * ctx) @ p["w_out"] + p["b_out"]


def init_params(key, n_feat, hidden_dim, d_k):
    ks = jax.random.split(key, 8)
    scale = 0.1
    return {
        "w_gate": jax.random.normal(ks[0], (n_feat, hidden_dim), jnp.float32) * scale,
        "b_gate": jnp.zeros((1, hidden_dim), jnp.float32),
        "w_v":    jax.random.normal(ks[1], (n_feat, hidden_dim), jnp.float32) * scale,
        "b_v":    jnp.zeros((1, hidden_dim), jnp.float32),
        "w_qk":   jax.random.normal(ks[2], (n_feat, d_k), jnp.float32) * scale,
        "b_qk":   jnp.zeros((1, d_k), jnp.float32),
        "gamma_q": jax.random.uniform(ks[3], (1, d_k), jnp.float32, -1.0, 1.0),
        "beta_q":  jnp.zeros((1, d_k), jnp.float32),
        "gamma_k": jax.random.uniform(ks[4], (1, d_k), jnp.float32, -1.0, 1.0),
        "beta_k":  jnp.zeros((1, d_k), jnp.float32),
        "w_out":  jax.random.normal(ks[5], (hidden_dim, n_feat), jnp.float32) * scale,
        "b_out":  jnp.zeros((1, n_feat), jnp.float32),
    }


if __name__ == "__main__":
    B, T, n_feat = 2, 8, 32
    hidden_dim = 2 * n_feat
    d_k = 128

    key = jax.random.PRNGKey(0)
    kx, kp = jax.random.split(key)
    x = jax.random.normal(kx, (B, T, n_feat), jnp.float32)
    params = init_params(kp, n_feat, hidden_dim, d_k)

    ref = jax.block_until_ready(gau_reference(x, params, d_k))

    # 1) bf16 MXU operands (default, v6e/v7x-oriented), f32 accumulation.
    packed_bf16 = prepare_gau_params(params, d_k, mxu_dtype=jnp.bfloat16)
    out_bf16 = jax.block_until_ready(gau_forward(x, packed_bf16))
    assert out_bf16.shape == (B, T, n_feat)
    assert jnp.allclose(out_bf16, ref, atol=5e-2, rtol=5e-2), "bf16 mismatch"

    # 2) f32 MXU operands, tighter check (exact reciprocal).
    packed_f32 = prepare_gau_params(params, d_k, mxu_dtype=jnp.float32)
    out_f32 = jax.block_until_ready(
        gau_forward(x, packed_f32, approx_recip=False))
    assert jnp.allclose(out_f32, ref, atol=1e-2, rtol=1e-2), "f32 mismatch"

    # 3) ragged sequence (exercises T padding + additive key-bias masking).
    T2 = 20
    x2 = jax.random.normal(jax.random.PRNGKey(1), (B, T2, n_feat), jnp.float32)
    ref2 = jax.block_until_ready(gau_reference(x2, params, d_k))
    out2 = jax.block_until_ready(gau_forward(x2, packed_f32))
    assert out2.shape == (B, T2, n_feat)
    assert jnp.allclose(out2, ref2, atol=1e-2, rtol=1e-2), "ragged mismatch"

    print("KERNEL_OK")
</pallas_src>

<mosaic_0001>
module attributes {stable_mosaic.version = 11 : i64} {
  func.func @kernel(%arg0: i32, %arg1: i32, %arg2: memref<1x8x32xf32, #tpu.memory_space<vmem>>, %arg3: memref<32x384xbf16, #tpu.memory_space<vmem>>, %arg4: memref<1x384xf32, #tpu.memory_space<vmem>>, %arg5: memref<4x128xf32, #tpu.memory_space<vmem>>, %arg6: memref<1x8x128xbf16, #tpu.memory_space<vmem>>, %arg7: memref<1x8x128xbf16, #tpu.memory_space<vmem>>, %arg8: memref<1x8x128xbf16, #tpu.memory_space<vmem>>, %arg9: memref<1x8x128xbf16, #tpu.memory_space<vmem>>) attributes {dimension_semantics = [#tpu.dimension_semantics<parallel>, #tpu.dimension_semantics<parallel>], iteration_bounds = array<i64: 2, 1>, scalar_prefetch = 0 : i64, scratch_operands = 0 : i64, tpu.core_type = #tpu.core_type<tc>, window_params = [{transform_indices = @transform_0, window_bounds = array<i64: 1, 8, 32>}, {pipeline_mode = #tpu.pipeline_mode<synchronous>, transform_indices = @transform_1, window_bounds = array<i64: 32, 384>}, {pipeline_mode = #tpu.pipeline_mode<synchronous>, transform_indices = @transform_2, window_bounds = array<i64: 1, 384>}, {pipeline_mode = #tpu.pipeline_mode<synchronous>, transform_indices = @transform_3, window_bounds = array<i64: 4, 128>}, {transform_indices = @transform_4, window_bounds = array<i64: 1, 8, 128>}, {transform_indices = @transform_5, window_bounds = array<i64: 1, 8, 128>}, {transform_indices = @transform_6, window_bounds = array<i64: 1, 8, 128>}, {transform_indices = @transform_7, window_bounds = array<i64: 1, 8, 128>}]} {
    %c0 = arith.constant 0 : index
    %c0_0 = arith.constant 0 : index
    %c0_1 = arith.constant 0 : index
    %0 = vector.load %arg2[%c0, %c0_0, %c0_1] : memref<1x8x32xf32, #tpu.memory_space<vmem>>, vector<1x8x32xf32>
    %1 = vector.shape_cast %0 : vector<1x8x32xf32> to vector<8x32xf32>
    %2 = arith.truncf %1 : vector<8x32xf32> to vector<8x32xbf16>
    %c0_2 = arith.constant 0 : index
    %c0_3 = arith.constant 0 : index
    %3 = vector.load %arg3[%c0_2, %c0_3] : memref<32x384xbf16, #tpu.memory_space<vmem>>, vector<32x384xbf16>
    %cst = arith.constant dense<0.000000e+00> : vector<8x384xf32>
    %4 = tpu.matmul %2, %3, %cst {dimension_numbers = #tpu.dot_dimension_numbers<[1], [0], [0], [1], [0, 0, 1, 1], [], []>} : vector<8x32xbf16>, vector<32x384xbf16>, vector<8x384xf32> -> vector<8x384xf32>
    %c0_4 = arith.constant 0 : index
    %c0_5 = arith.constant 0 : index
    %5 = vector.load %arg4[%c0_4, %c0_5] : memref<1x384xf32, #tpu.memory_space<vmem>>, vector<1x384xf32>
    %6 = vector.broadcast %5 : vector<1x384xf32> to vector<8x384xf32>
    %7 = arith.addf %4, %6 : vector<8x384xf32>
    %8 = arith.negf %7 : vector<8x384xf32>
    %9 = math.exp %8 : vector<8x384xf32>
    %cst_6 = arith.constant 1.000000e+00 : f32
    %10 = vector.broadcast %cst_6 : f32 to vector<8x384xf32>
    %11 = arith.addf %10, %9 : vector<8x384xf32>
    %12 = arith.divf %10, %11 : vector<8x384xf32>
    %13 = arith.mulf %7, %12 : vector<8x384xf32>
    %14 = vector.extract_strided_slice %13 {offsets = [0, 0], sizes = [8, 128], strides = [1, 1]} : vector<8x384xf32> to vector<8x128xf32>
    %15 = vector.extract_strided_slice %13 {offsets = [0, 128], sizes = [8, 128], strides = [1, 1]} : vector<8x384xf32> to vector<8x128xf32>
    %16 = vector.extract_strided_slice %13 {offsets = [0, 256], sizes = [8, 128], strides = [1, 1]} : vector<8x384xf32> to vector<8x128xf32>
    %c0_7 = arith.constant 0 : index
    %c0_8 = arith.constant 0 : index
    %17 = vector.load %arg5[%c0_7, %c0_8] : memref<4x128xf32, #tpu.memory_space<vmem>>, vector<1x128xf32>
    %c1 = arith.constant 1 : index
    %c0_9 = arith.constant 0 : index
    %18 = vector.load %arg5[%c1, %c0_9] : memref<4x128xf32, #tpu.memory_space<vmem>>, vector<1x128xf32>
    %c2 = arith.constant 2 : index
    %c0_10 = arith.constant 0 : index
    %19 = vector.load %arg5[%c2, %c0_10] : memref<4x128xf32, #tpu.memory_space<vmem>>, vector<1x128xf32>
    %c3 = arith.constant 3 : index
    %c0_11 = arith.constant 0 : index
    %20 = vector.load %arg5[%c3, %c0_11] : memref<4x128xf32, #tpu.memory_space<vmem>>, vector<1x128xf32>
    %21 = vector.broadcast %17 : vector<1x128xf32> to vector<8x128xf32>
    %22 = arith.mulf %16, %21 : vector<8x128xf32>
    %23 = vector.broadcast %18 : vector<1x128xf32> to vector<8x128xf32>
    %24 = arith.addf %22, %23 : vector<8x128xf32>
    %25 = arith.truncf %24 : vector<8x128xf32> to vector<8x128xbf16>
    %c0_12 = arith.constant 0 : index
    %c0_13 = arith.constant 0 : index
    %c0_14 = arith.constant 0 : index
    %26 = vector.load %arg6[%c0_12, %c0_13, %c0_14] : memref<1x8x128xbf16, #tpu.memory_space<vmem>>, vector<1x8x128xbf16>
    %27 = vector.shape_cast %26 : vector<1x8x128xbf16> to vector<8x128xbf16>
    %28 = vector.shape_cast %25 : vector<8x128xbf16> to vector<1x8x128xbf16>
    tpu.vector_store %arg6[%c0_12, %c0_13, %c0_14], %28 {strides = array<i32>} : memref<1x8x128xbf16, #tpu.memory_space<vmem>>, vector<1x8x128xbf16>,
    %29 = vector.broadcast %19 : vector<1x128xf32> to vector<8x128xf32>
    %30 = arith.mulf %16, %29 : vector<8x128xf32>
    %31 = vector.broadcast %20 : vector<1x128xf32> to vector<8x128xf32>
    %32 = arith.addf %30, %31 : vector<8x128xf32>
    %33 = arith.truncf %32 : vector<8x128xf32> to vector<8x128xbf16>
    %c0_15 = arith.constant 0 : index
    %c0_16 = arith.constant 0 : index
    %c0_17 = arith.constant 0 : index
    %34 = vector.load %arg7[%c0_15, %c0_16, %c0_17] : memref<1x8x128xbf16, #tpu.memory_space<vmem>>, vector<1x8x128xbf16>
    %35 = vector.shape_cast %34 : vector<1x8x128xbf16> to vector<8x128xbf16>
    %36 = vector.shape_cast %33 : vector<8x128xbf16> to vector<1x8x128xbf16>
    tpu.vector_store %arg7[%c0_15, %c0_16, %c0_17], %36 {strides = array<i32>} : memref<1x8x128xbf16, #tpu.memory_space<vmem>>, vector<1x8x128xbf16>,
    %37 = arith.truncf %14 : vector<8x128xf32> to vector<8x128xbf16>
    %c0_18 = arith.constant 0 : index
    %c0_19 = arith.constant 0 : index
    %c0_20 = arith.constant 0 : index
    %38 = vector.load %arg8[%c0_18, %c0_19, %c0_20] : memref<1x8x128xbf16, #tpu.memory_space<vmem>>, vector<1x8x128xbf16>
    %39 = vector.shape_cast %38 : vector<1x8x128xbf16> to vector<8x128xbf16>
    %40 = vector.shape_cast %37 : vector<8x128xbf16> to vector<1x8x128xbf16>
    tpu.vector_store %arg8[%c0_18, %c0_19, %c0_20], %40 {strides = array<i32>} : memref<1x8x128xbf16, #tpu.memory_space<vmem>>, vector<1x8x128xbf16>,
    %41 = arith.truncf %15 : vector<8x128xf32> to vector<8x128xbf16>
    %c0_21 = arith.constant 0 : index
    %c0_22 = arith.constant 0 : index
    %c0_23 = arith.constant 0 : index
    %42 = vector.load %arg9[%c0_21, %c0_22, %c0_23] : memref<1x8x128xbf16, #tpu.memory_space<vmem>>, vector<1x8x128xbf16>
    %43 = vector.shape_cast %42 : vector<1x8x128xbf16> to vector<8x128xbf16>
    %44 = vector.shape_cast %41 : vector<8x128xbf16> to vector<1x8x128xbf16>
    tpu.vector_store %arg9[%c0_21, %c0_22, %c0_23], %44 {strides = array<i32>} : memref<1x8x128xbf16, #tpu.memory_space<vmem>>, vector<1x8x128xbf16>,
    return
  }
  func.func @transform_0(%arg0: i32, %arg1: i32) -> (i32, i32, i32) {
    %c0_i32 = arith.constant 0 : i32
    %c0_i32_0 = arith.constant 0 : i32
    return %arg0, %arg1, %c0_i32 : i32, i32, i32
  }
  func.func @transform_1(%arg0: i32, %arg1: i32) -> (i32, i32) {
    %c0_i32 = arith.constant 0 : i32
    %c0_i32_0 = arith.constant 0 : i32
    %c0_i32_1 = arith.constant 0 : i32
    return %c0_i32, %c0_i32_0 : i32, i32
  }
  func.func @transform_2(%arg0: i32, %arg1: i32) -> (i32, i32) {
    %c0_i32 = arith.constant 0 : i32
    %c0_i32_0 = arith.constant 0 : i32
    %c0_i32_1 = arith.constant 0 : i32
    return %c0_i32, %c0_i32_0 : i32, i32
  }
  func.func @transform_3(%arg0: i32, %arg1: i32) -> (i32, i32) {
    %c0_i32 = arith.constant 0 : i32
    %c0_i32_0 = arith.constant 0 : i32
    %c0_i32_1 = arith.constant 0 : i32
    return %c0_i32, %c0_i32_0 : i32, i32
  }
  func.func @transform_4(%arg0: i32, %arg1: i32) -> (i32, i32, i32) {
    %c0_i32 = arith.constant 0 : i32
    %c0_i32_0 = arith.constant 0 : i32
    return %arg0, %arg1, %c0_i32 : i32, i32, i32
  }
  func.func @transform_5(%arg0: i32, %arg1: i32) -> (i32, i32, i32) {
    %c0_i32 = arith.constant 0 : i32
    %c0_i32_0 = arith.constant 0 : i32
    return %arg0, %arg1, %c0_i32 : i32, i32, i32
  }
  func.func @transform_6(%arg0: i32, %arg1: i32) -> (i32, i32, i32) {
    %c0_i32 = arith.constant 0 : i32
    %c0_i32_0 = arith.constant 0 : i32
    return %arg0, %arg1, %c0_i32 : i32, i32, i32
  }
  func.func @transform_7(%arg0: i32, %arg1: i32) -> (i32, i32, i32) {
    %c0_i32 = arith.constant 0 : i32
    %c0_i32_0 = arith.constant 0 : i32
    return %arg0, %arg1, %c0_i32 : i32, i32, i32
  }
}

</mosaic_0001>

<bundles_post_ra>
// kernel: tpu_custom_call.1
= control target key start
LH: loop header
LB: loop body
LE: loop exit
PB: predicated region body
PF: predicated region fallthrough
CT: control target
= control target key end

     0   :  { %s1620_s0 = inlined_call_operand.hbm [shape: f32[2,8,32], index: 0, kind: input, shape index: {}]   ;;  %s1621_s1 = inlined_call_operand.hbm [shape: bf16[32,384], index: 1, kind: input, shape index: {}]   ;;  %s1622_s2 = inlined_call_operand.hbm [shape: f32[1,384], index: 2, kind: input, shape index: {}]   ;;  %s1623_s3 = inlined_call_operand.vmem [shape: f32[4,128], index: 3, kind: input, shape index: {}]   ;;  %s1624_s4 = inlined_call_operand.hbm [shape: bf16[2,8,128], index: 4, kind: output, shape index: {0}]   ;;  %s1625_s5 = inlined_call_operand.hbm [shape: bf16[2,8,128], index: 5, kind: output, shape index: {1}]   ;;  %s1626_s6 = inlined_call_operand.hbm [shape: bf16[2,8,128], index: 6, kind: output, shape index: {2}]   ;;  %s1627_s7 = inlined_call_operand.hbm [shape: bf16[2,8,128], index: 7, kind: output, shape index: {3}]  }
   0x1   :  { %1634 = sst [smem:[#allocation23_spill]] %s1620_s0 }
   0x2   :  { %1635 = sst [smem:[#allocation24_spill]] %s1621_s1 }
   0x3   :  { %1636 = sst [smem:[#allocation25_spill]] %s1622_s2 }
   0x4   :  { %1637 = sst [smem:[#allocation26_spill]] %s1623_s3 }
   0x5   :  { %13 = vsyncpa [#allocation3], 0 }
   0x6   :  { %15 = vsyncpa [#allocation3 + $0x1], 0 }
   0x7   :  { %16 = vsyncpa [#allocation6], 0 }
   0x8   :  { %17 = vsyncpa [#allocation4], 0 }
   0x9   :  { %19 = vsyncpa [#allocation4 + $0x1], 0 }
   0xa   :  { %20 = vsyncpa [#allocation10], 0 }
   0xb   :  { %22 = vsyncpa [#allocation10 + $0x1], 0 }
   0xc   :  { %23 = vsyncpa [#allocation13], 0 }
   0xd   :  { %25 = vsyncpa [#allocation13 + $0x1], 0  ;;  %s1316_s24 = smov 0   ;;  %s1318_s25 = smov 0  }
   0xe   :  { %s1320_s26 = smov 0   ;;  %s1322_s27 = smov 0  }
   0xf   :  { %s1324_s28 = smov 0   ;;  %s1326_s29 = smov 0  }
  0x10 LB: > { %1638 = sst [smem:[#allocation19_spill]] %s1250_s26  ;;  %s1347_s30 = sadd.s32 4294967295, %s1262_s29   ;;  %s1262_s29 = sphi %s1326_s29, %s31_s29   ;;  %s1258_s28 = sphi %s1324_s28, %s1662_s28   ;;  %s1254_s27 = sphi %s1322_s27, %s1661_s27   ;;  %s1250_s26 = sphi %s1320_s26, %s1660_s26   ;;  %s1246_s25 = sphi %s1318_s25, %s1664_s25   ;;  %s1242_s24 = sphi %s1316_s24, %s1663_s24  }
  0x11   : > { %1639 = sst [smem:[#allocation20_spill]] %s1258_s28  ;;  %s1629_s8 = sadd.s32 4294967294, %s1262_s29  }
  0x12   : > { %p65_p0 = scmp.ne.s32.totalorder %s1246_s25, %s1242_s24  ;;  %p1628_p1 = scmp.eq.s32.totalorder %s1347_s30, 0 }
  0x13   : > { %p160_p3 = scmp.eq.s32.totalorder %s1629_s8, 1  ;;  %p839_p5 = scmp.ge.s32.totalorder %s1262_s29, 1 }
  0x14   : > { %p1358_p4 = por %p1628_p1, %p65_p0  ;;  %p251_p7 = scmp.lt.s32.totalorder %s1262_s29, 3 }
  0x15   : > { %p1363_p6 = por %p160_p3, %p65_p0  ;;  %s1264_s12 = smov [#allocation5]  }
  0x16   : > { %p1368_p8 = pnand %p839_p5, %p251_p7  ;;  %s263_s13 = sshll.u32 %s1264_s12, 4  ;;  %s264_s13 = int_to_ptr.vmem [resolvable:$true] %s263_s13 }
  0x17   : > { %s1265_s15 = smov [#allocation7]   ;;  %s1023_s17 = scalar_lea.vmem %s264_s13, 768 }
  0x18   : > { %p907_p9 = pneg %p1368_p8  ;;  %s277_s16 = sshll.u32 %s1265_s15, 4  ;;  %s278_s16 = int_to_ptr.vmem [resolvable:$true] %s277_s16 }
  0x19   : > { %p1024_p13 = scmp.ne.s32.totalorder %s264_s13, %s1023_s17  ;;  %p1031_p5 = scmp.lt.s32.totalorder %s264_s13, %s264_s13 }
  0x1a   : > { %p1377_p11 = pnand %p907_p9, %p1628_p1  ;;  %p1032_p7 = scmp.lt.s32.totalorder %s1023_s17, %s1023_s17 }
  0x1c   : > { %p1014_p12 = pneg %p1377_p11  ;;  %p1033_p10 = por %p1032_p7, %p1031_p5 }
  0x1e   : > { %p1026_p0 = pnand %p1024_p13, %p1014_p12 }
  0x20   : > { %p1027_p3 = pneg %p1026_p0 }
  0x22   : > { %p1034_p9 = pnand %p1033_p10, %p1027_p3 }
  0x24   : > { %1037 = shalt.err (!%p1034_p9)
}
  0x25   : > { %s1266_s18 = smov 192   ;;  %s1267_s19 = smov 12  }
  0x26   : > { %s1644_s1 = sld [smem:[#allocation24_spill]]  ;;  %s1049_s22 = scalar_lea.vmem %s278_s16, 48 }
  0x27   : > { %p1050_p1 = scmp.ne.s32.totalorder %s278_s16, %s1049_s22  ;;  %s1056_s23 = scalar_lea.vmem %s278_s16, 64 }
  0x28   : > { %p1057_p2 = scmp.lt.s32.totalorder %s278_s16, %s278_s16  ;;  %p1058_p5 = scmp.lt.s32.totalorder %s1056_s23, %s1049_s22 }
  0x29   : > { %p1052_p13 = pnand %p1050_p1, %p1014_p12 }
  0x2a   : > { %p1059_p10 = por %p1058_p5, %p1057_p2 }
  0x2b   : > { %p1053_p0 = pneg %p1052_p13 }
  0x2c   : > { %910 = dma.hbm_to_vmem [thread:$0]  (!%p1377_p11), %s1644_s1, 768, %s264_s13, [#allocation6], %s1266_s18, %s1266_s18, %s1267_s19  }
  0x2d   : > { %p1060_p3 = pnand %p1059_p10, %p1053_p0 }
  0x2f   : > { %1063 = shalt.err (!%p1060_p3)
}
  0x30   : > { %s1645_s2 = sld [smem:[#allocation25_spill]]  ;;  %s43_s13 = sadd.s32 1, %s1258_s28 }
  0x31   : > { %s52_s17 = sadd.s32 1, %s1250_s26  ;;  %p45_p1 = scmp.ge.s32.totalorder %s43_s13, 2 }
  0x32   : > { %p59_p2 = scmp.ne.s32.totalorder %s1250_s26, %s1246_s25  ;;  %p60_p12 = scmp.eq.s32.totalorder %s1262_s29, 0 }
  0x33   : > { %p933_p7 = scmp.lt.s32.totalorder %s1262_s29, 2  ;;  %s1666_s13 = smov (%p45_p1, %s43_s13), 0 }
  0x34   : > { %1646 = sst [smem:[#allocation21_spill]] %s1666_s13  ;;  %p61_p9 = por %p60_p12, %p59_p2 }
  0x35   : > { %p1647_p13 = scmp.eq.s32.totalorder %s1347_s30, 1  ;;  %s47_s18 = ssub.s32 %s1258_s28, %s1666_s13 }
  0x36   : > { %913 = dma.hbm_to_vmem [thread:$0]  (!%p1377_p11), %s1645_s2, 48, %s278_s16, [#allocation6]  }
  0x37   : > { %p1409_p0 = por %p1647_p13, %p59_p2  ;;  %s291_s19 = sand.u32 1, %s1250_s26  }
  0x38   : > { %p50_p5 = scmp.eq.s32.totalorder %s47_s18, 0  ;;  %s843_s16 = sshll.u32 %s291_s19, 3 }
  0x39   : > { %s844_s20 = sshll.u32 %s1258_s28, 7  ;;  %s1650_s0 = sld [smem:[#allocation23_spill]] }
  0x3a   : > { %s1418_s21 = scalar_select %p50_p5, %s1250_s26, %s52_s17  }
  0x3b   : > { %s295_s15 = scalar_lea.vmem [#allocation2], %s843_s16  ;;  %p1425_p11 = pnand %p933_p7, %p61_p9 }
  0x3c   : > { %1649 = sst [smem:[#allocation22_spill]] %s1418_s21  ;;  %s303_s8 = sshll.u32 %s295_s15, 4  ;;  %s304_s8 = int_to_ptr.vmem [resolvable:$true] %s303_s8 }
  0x3d   : > { %s292_s2 = scalar_lea.sflag [#allocation3], %s291_s19  ;;  %p1066_p10 = pneg %p1425_p11 }
  0x3e   : > { %s1077_s18 = scalar_lea.vmem %s304_s8, 128  ;;  %s1268_s17 = smov [#allocation2]  }
  0x3f   : > { %s301_s12 = scalar_lea.hbm %s1650_s0, %s844_s20  ;;  %p1078_p3 = scmp.ne.s32.totalorder %s304_s8, %s1077_s18 }
  0x40   : > { %s1082_s13 = sshll.u32 %s1268_s17, 4  ;;  %s1083_s13 = int_to_ptr.vmem [resolvable:$false] %s1082_s13 }
  0x41   : > { %p1080_p1 = pnand %p1078_p3, %p1066_p10  ;;  %s1084_s20 = scalar_lea.vmem %s1083_s13, 256 }
  0x42   : > { %p1085_p12 = scmp.lt.s32.totalorder %s304_s8, %s1083_s13  ;;  %p1086_p13 = scmp.lt.s32.totalorder %s1084_s20, %s1077_s18 }
  0x43   : > { %p1081_p2 = pneg %p1080_p1 }
  0x44   : > { %p1087_p5 = por %p1086_p13, %p1085_p12 }
  0x46   : > { %p1088_p7 = pnand %p1087_p5, %p1081_p2 }
  0x48   : > { %1091 = shalt.err (!%p1088_p7)
}
  0x49   : > { %917 = dma.hbm_to_vmem [thread:$0]  (!%p1425_p11), %s301_s12, 128, %s304_s8, %s292_s2  }
  0x4a   : > { %312 = sbr.rel (%p1368_p8) target bundleno = 407 (0x197), region = 36  ;;  %s1436_s19 = sand.u32 (!%p1368_p8), 1, %s1246_s25  }
  0x4b   : > { %s846_s16 = sshll.u32 (!%p1368_p8), %s1436_s19, 3  ;;  %s315_s22 = scalar_lea.sflag (!%p1368_p8), [#allocation3], %s1436_s19 }
  0x4c   : > { %s318_s23 = scalar_lea.vmem (!%p1368_p8), [#allocation2], %s846_s16 }
  0x4f   : > { %1221 = dma.done.wait (%p1358_p4), %s315_s22, 128  }
  0x50   : > { %1223 = vsyncadd (%p1358_p4), %s315_s22, 4294967168  ;;  %p1652_p9 = scmp.eq.s32.totalorder %s1347_s30, 0 }
  0x52   : > { %1225 = dma.done.wait (%p1652_p9), [#allocation6], 816   ;;  %p1653_p11 = pmov %p1652_p9 }
  0x53   : > { %v1269_v0 = vmov 0.0   ;;  %vm1270_vm0 = vmmov 0   ;;  %v1271_v1 = vmov 0   ;;  %v992_v2 = vld [vmem:[#allocation5 + $0x1c] ss:$12 sps:$4 sm:$0xff]   ;;  %vm432_vm1 = vcmask 261120  }
  0x54   : > { %1227 = vsyncadd (%p1653_p11), [#allocation6], 4294966480  ;;  %881 = vmatprep.subr.bf16.mxu1 %v1269_v0  ;;  %885 = vmatprep.mubr.msk.bf16.mxu1 %vm1270_vm0, %v1269_v0  ;;  %v994_v3 = vld [vmem:[#allocation5 + $0x20] ss:$12 sps:$4 sm:$0xff]   ;;  %v995_v4 = vld [vmem:[#allocation5 + $0x18] ss:$12 sps:$4 sm:$0xff]   ;;  %v385_v10 = vlaneseq }
  0x55   : > { %468 = vmatprep.mubr.bf16.mxu0 %v1271_v1  ;;  %448 = vmatprep.subr.bf16.mxu0 %v992_v2  ;;  %v996_v5 = vld [vmem:[#allocation5 + $0x4] ss:$12 sps:$4 sm:$0xff]   ;;  %v998_v6 = vld [vmem:[#allocation5 + $0x8] ss:$12 sps:$4 sm:$0xff]   ;;  %v999_v7 = vld [vmem:[#allocation5] ss:$12 sps:$4 sm:$0xff]  }
  0x56   : > { %882 = vmatpush3.bf16.msra.mxu1 %v994_v3  ;;  %449 = vmatpush1.bf16.msra.mxu0 %v995_v4  ;;  %v373_v8 = vld [vmem:[%s318_s23] sm:$0xff]  ;;  %v386_v11 = vshrl.u32 %v385_v10, 7  ;;  %s1449_s1 = sshll.u32 %s1436_s19, 2  ;;  %s1453_s8 = sshll.u32 %s1254_s27, 6 }
  0x57   : > { %883 = vmatprep.subr.bf16.mxu1 %v1269_v0  ;;  %450 = vmatprep.subr.bf16.mxu0 %v996_v5  ;;  %v374_v9 = vpack.c.bf16 %v373_v8, %v373_v8  ;;  %v383_v13 = vld [vmem:[#allocation7] sm:$0x7]  ;;  %s1654_s3 = sld [smem:[#allocation26_spill]]  ;;  %s1631_s15 = scalar_lea.vmem [#allocation9], %s1449_s1 }
  0x58   : > { %v395_v12 = vsub.s32 2, %v386_v11  ;;  %v387_v14 = vsub.s32 0, %v386_v11  ;;  %v391_v15 = vsub.s32 1, %v386_v11  ;;  %s614_s18 = sshll.u32 %s1631_s15, 4  ;;  %s1474_s9 = scalar_lea.hbm %s1625_s5, %s1453_s8  ;;  %s1476_s18 = int_to_ptr.vmem [resolvable:$true] %s614_s18 }
  0x59   : > { %s371_s11 = scalar_lea.vmem [#allocation12], %s1449_s1  ;;  %s350_s12 = scalar_lea.vmem [#allocation8], %s1449_s1 }
  0x5a   : > { %884 = vmatpush3.bf16.msra.mxu1 %v998_v6  ;;  %451 = vmatpush1.bf16.msra.mxu0 %v999_v7  ;;  %v396_v16 = vrot.slane %v383_v13, %v395_v12  ;;  %v388_v17 = vrot.slane %v383_v13, %v387_v14  ;;  %v392_v19 = vrot.slane %v383_v13, %v391_v15  ;;  %s642_s13 = sshll.u32 %s371_s11, 4  ;;  %s600_s17 = sshll.u32 %s350_s12, 4  ;;  %s1487_s13 = int_to_ptr.vmem [resolvable:$true] %s642_s13  ;;  %s1495_s17 = int_to_ptr.vmem [resolvable:$true] %s600_s17 }
  0x5b   : > { %s364_s27 = scalar_lea.vmem [#allocation11], %s1449_s1  ;;  %s1485_s23 = scalar_lea.hbm %s1627_s7, %s1453_s8 }
  0x5c   : > { %s628_s20 = sshll.u32 %s364_s27, 4  ;;  %s1493_s0 = scalar_lea.hbm %s1624_s4, %s1453_s8  ;;  %s1503_s20 = int_to_ptr.vmem [resolvable:$true] %s628_s20 }
  0x5d   : > { %886 = vmatmul.mubr.msk.bf16.vlgmr.msra.gmra.mxu1 %vm432_vm1, %v374_v9  ;;  %859 = vmatmul.mubr.msk.bf16.vlgmr.msra.gmra.mxu0 %vm432_vm1, %v374_v9  ;;  %v864_v40 = vld [vmem:[%s1654_s3] ss:$0 sm:$0xff]  ;;  %v866_v41 = vld [vmem:[%s1654_s3 + $0x2] ss:$0 sm:$0xff]  ;;  %v865_v44 = vld [vmem:[%s1654_s3 + $0x1] ss:$0 sm:$0xff]  ;;  %s1501_s16 = scalar_lea.hbm %s1626_s6, %s1453_s8 }
  0x5e   : > { %v867_v45 = vld [vmem:[%s1654_s3 + $0x3] ss:$0 sm:$0xff]  ;;  %s1655_s22 = scalar_lea.vmem [#allocation9], %s1449_s1  ;;  %s586_s28 = scalar_lea.sflag [#allocation13], %s1436_s19 }
  0x5f   : > { %s1092_s21 = scalar_lea.vmem %s1487_s13, 64  ;;  %s1272_s2 = smov [#allocation12]  }
  0x60   : > { %p1093_p4 = scmp.ne.s32.totalorder %s1487_s13, %s1092_s21  ;;  %s1096_s15 = sshll.u32 %s1272_s2, 4  ;;  %s1097_s15 = int_to_ptr.vmem [resolvable:$false] %s1096_s15 }
  0x61   : > { %s1098_s26 = scalar_lea.vmem %s1097_s15, 128  ;;  %p1099_p3 = scmp.lt.s32.totalorder %s1487_s13, %s1097_s15 }
  0x62   : > { %p1094_p8 = pnand %p1093_p4, %p1409_p0  ;;  %p1100_p1 = scmp.lt.s32.totalorder %s1098_s26, %s1092_s21 }
  0x64   : > { %p1095_p10 = pneg %p1094_p8  ;;  %p1101_p2 = por %p1100_p1, %p1099_p3 }
  0x66   : > { %p1102_p12 = pnand %p1101_p2, %p1095_p10 }
 0x11d   : > { %v511_v18 = vpop.f32.mrf.mxu1  ;;  %v470_v21 = vpop.f32.mrf.mxu0 }
 0x11e   : > { %v512_v20 = vadd.f32 %v511_v18, %v396_v16  ;;  %v471_v22 = vadd.f32 %v470_v21, %v388_v17 }
 0x11f   : > { %v887_v23 = vpop.f32.mrf.mxu1  ;;  %v472_v25 = vpop.f32.mrf.mxu0 }
 0x120   : > { %v863_v24 = vmul.f32 -1.442695, %v512_v20  ;;  %v861_v26 = vmul.f32 -1.442695, %v471_v22  ;;  %v473_v27 = vadd.f32 %v472_v25, %v392_v19 }
 0x121   : > { %v514_v28 = vpop.f32.mrf.mxu1  ;;  %v474_v29 = vpop.f32.mrf.mxu0 }
 0x122   : > { %1000 = vpow2.f32 %v863_v24  ;;  %v862_v30 = vmul.f32 -1.442695, %v473_v27 }
 0x123   : > { %1002 = vpow2.f32 %v861_v26  ;;  %v888_v31 = vpop.f32.mrf.mxu1  ;;  %v475_v32 = vpop.f32.mrf.mxu0 }
 0x124   : > { %1004 = vpow2.f32 %v862_v30 }
 0x12f   : > { %v1001_v33 = vpop.eup %1000 }
 0x130   : > { %v1003_v34 = vpop.eup %1002  ;;  %v528_v35 = vadd.f32 1.0, %v1001_v33 }
 0x131   : > { %v526_v36 = vadd.f32 1.0, %v1003_v34  ;;  %v1005_v37 = vpop.eup %1004 }
 0x132   : > { %1006 = vrcp.f32 %v528_v35  ;;  %v527_v38 = vadd.f32 1.0, %v1005_v37 }
 0x133   : > { %1008 = vrcp.f32 %v526_v36 }
 0x134   : > { %1010 = vrcp.f32 %v527_v38 }
 0x13f   : > { %v1007_v39 = vpop.eup %1006 }
 0x140   : > { %v1009_v42 = vpop.eup %1008  ;;  %v537_v43 = vmul.f32 %v1007_v39, %v512_v20 }
 0x141   : > { %v535_v46 = vmul.f32 %v1009_v42, %v471_v22  ;;  %v1011_v47 = vpop.eup %1010 }
 0x142   : > { %v546_v48 = vmul.f32 %v864_v40, %v537_v43  ;;  %v558_v49 = vmul.f32 %v866_v41, %v537_v43  ;;  %v536_v51 = vmul.f32 %v1011_v47, %v473_v27 }
 0x143   : > { %v566_v50 = vpack.c.bf16 %v535_v46, %v535_v46 }
 0x144   : > { %v551_v52 = vadd.f32 %v865_v44, %v546_v48  ;;  %v563_v53 = vadd.f32 %v867_v45, %v558_v49  ;;  %v568_v54 = vpack.c.bf16 %v536_v51, %v536_v51 }
 0x145   : > { %567 = vst [vmem:[%s364_s27] sm:$0xf] %v566_v50 }
 0x146   : > { %v552_v55 = vpack.c.bf16 %v551_v52, %v551_v52  ;;  %v564_v56 = vpack.c.bf16 %v563_v53, %v563_v53  ;;  %569 = vst [vmem:[%s371_s11] sm:$0xf] %v568_v54 }
 0x148   : > { %565 = vst [vmem:[%s1655_s22] sm:$0xf] %v564_v56  ;;  %553 = vst [vmem:[%s350_s12] sm:$0xf] %v552_v55 }
 0x149   : > { %1105 = shalt.err (!%p1102_p12)
}
 0x14a   : > { %s1106_s3 = scalar_lea.hbm %s1485_s23, 64  ;;  %s1110_s11 = scalar_lea.hbm %s1627_s7, 128 }
 0x14b   : > { %p1107_p13 = scmp.ne.s32.totalorder %s1485_s23, %s1106_s3  ;;  %p1111_p9 = scmp.lt.s32.totalorder %s1485_s23, %s1627_s7 }
 0x14c   : > { %p1112_p11 = scmp.lt.s32.totalorder %s1110_s11, %s1106_s3 }
 0x14d   : > { %p1108_p5 = pnand %p1107_p13, %p1409_p0 }
 0x14e   : > { %p1113_p4 = por %p1112_p11, %p1111_p9 }
 0x14f   : > { %p1109_p7 = pneg %p1108_p5 }
 0x151   : > { %p1114_p8 = pnand %p1113_p4, %p1109_p7 }
 0x153   : > { %1117 = shalt.err (!%p1114_p8)
}
 0x154   : > { %902 = dma.vmem_to_hbm [thread:$0]  (%p1409_p0), %s1487_s13, 64, %s1485_s23, %s586_s28  }
 0x155   : > { %s1656_s26 = sand.u32 1, %s1347_s30   ;;  %s1118_s22 = scalar_lea.vmem %s1476_s18, 64 }
 0x156   : > { %s1530_s21 = scalar_lea.sflag [#allocation10], %s1656_s26  ;;  %p1119_p10 = scmp.ne.s32.totalorder %s1476_s18, %s1118_s22 }
 0x157   : > { %s1273_s2 = smov [#allocation9]  }
 0x158   : > { %p1120_p3 = pnand %p1119_p10, %p1409_p0  ;;  %s1122_s15 = sshll.u32 %s1273_s2, 4  ;;  %s1123_s15 = int_to_ptr.vmem [resolvable:$false] %s1122_s15 }
 0x159   : > { %s1124_s3 = scalar_lea.vmem %s1123_s15, 128  ;;  %p1125_p2 = scmp.lt.s32.totalorder %s1476_s18, %s1123_s15 }
 0x15a   : > { %p1121_p1 = pneg %p1120_p3  ;;  %p1126_p12 = scmp.lt.s32.totalorder %s1124_s3, %s1118_s22 }
 0x15c   : > { %p1127_p13 = por %p1126_p12, %p1125_p2 }
 0x15e   : > { %p1128_p5 = pnand %p1127_p13, %p1121_p1 }
 0x160   : > { %1131 = shalt.err (!%p1128_p5)
}
 0x161   : > { %s1132_s28 = scalar_lea.hbm %s1474_s9, 64  ;;  %s1136_s23 = scalar_lea.hbm %s1625_s5, 128 }
 0x162   : > { %p1133_p7 = scmp.ne.s32.totalorder %s1474_s9, %s1132_s28  ;;  %p1137_p4 = scmp.lt.s32.totalorder %s1474_s9, %s1625_s5 }
 0x163   : > { %p1138_p8 = scmp.lt.s32.totalorder %s1136_s23, %s1132_s28 }
 0x164   : > { %p1134_p9 = pnand %p1133_p7, %p1409_p0 }
 0x165   : > { %p1139_p10 = por %p1138_p8, %p1137_p4 }
 0x166   : > { %p1135_p11 = pneg %p1134_p9 }
 0x168   : > { %p1140_p3 = pnand %p1139_p10, %p1135_p11 }
 0x16a   : > { %1143 = shalt.err (!%p1140_p3)
}
 0x16b   : > { %900 = dma.vmem_to_hbm [thread:$0]  (%p1409_p0), %s1476_s18, 64, %s1474_s9, %s1530_s21  }
 0x16c   : > { %s571_s11 = scalar_lea.sflag [#allocation4], %s1436_s19  ;;  %s1144_s12 = scalar_lea.vmem %s1495_s17, 64 }
 0x16d   : > { %p1145_p1 = scmp.ne.s32.totalorder %s1495_s17, %s1144_s12  ;;  %s1274_s27 = smov [#allocation8]  }
 0x16e   : > { %s1148_s26 = sshll.u32 %s1274_s27, 4  ;;  %s1149_s26 = int_to_ptr.vmem [resolvable:$false] %s1148_s26 }
 0x16f   : > { %p1146_p2 = pnand %p1145_p1, %p1409_p0  ;;  %s1150_s22 = scalar_lea.vmem %s1149_s26, 128 }
 0x170   : > { %p1151_p13 = scmp.lt.s32.totalorder %s1495_s17, %s1149_s26  ;;  %p1152_p5 = scmp.lt.s32.totalorder %s1150_s22, %s1144_s12 }
 0x171   : > { %p1147_p12 = pneg %p1146_p2 }
 0x172   : > { %p1153_p7 = por %p1152_p5, %p1151_p13 }
 0x174   : > { %p1154_p9 = pnand %p1153_p7, %p1147_p12 }
 0x176   : > { %1157 = shalt.err (!%p1154_p9)
}
 0x177   : > { %s1158_s18 = scalar_lea.hbm %s1493_s0, 64  ;;  %s1162_s2 = scalar_lea.hbm %s1624_s4, 128 }
 0x178   : > { %p1159_p11 = scmp.ne.s32.totalorder %s1493_s0, %s1158_s18  ;;  %p1163_p10 = scmp.lt.s32.totalorder %s1493_s0, %s1624_s4 }
 0x179   : > { %p1164_p3 = scmp.lt.s32.totalorder %s1162_s2, %s1158_s18 }
 0x17a   : > { %p1160_p4 = pnand %p1159_p11, %p1409_p0 }
 0x17b   : > { %p1165_p1 = por %p1164_p3, %p1163_p10 }
 0x17c   : > { %p1161_p8 = pneg %p1160_p4 }
 0x17e   : > { %p1166_p2 = pnand %p1165_p1, %p1161_p8 }
 0x180   : > { %1169 = shalt.err (!%p1166_p2)
}
 0x181   : > { %899 = dma.vmem_to_hbm [thread:$0]  (%p1409_p0), %s1495_s17, 64, %s1493_s0, %s571_s11  }
 0x182   : > { %s1170_s28 = scalar_lea.vmem %s1503_s20, 64  ;;  %s1275_s30 = smov [#allocation11]  }
 0x183   : > { %p1171_p12 = scmp.ne.s32.totalorder %s1503_s20, %s1170_s28  ;;  %s1174_s13 = sshll.u32 %s1275_s30, 4  ;;  %s1175_s13 = int_to_ptr.vmem [resolvable:$false] %s1174_s13 }
 0x184   : > { %s1176_s23 = scalar_lea.vmem %s1175_s13, 128  ;;  %p1177_p7 = scmp.lt.s32.totalorder %s1503_s20, %s1175_s13 }
 0x185   : > { %p1172_p13 = pnand %p1171_p12, %p1409_p0  ;;  %p1178_p9 = scmp.lt.s32.totalorder %s1176_s23, %s1170_s28 }
 0x187   : > { %p1173_p5 = pneg %p1172_p13  ;;  %p1179_p11 = por %p1178_p9, %p1177_p7 }
 0x189   : > { %p1180_p4 = pnand %p1179_p11, %p1173_p5 }
 0x18b   : > { %1183 = shalt.err (!%p1180_p4)
}
 0x18c   : > { %s1184_s1 = scalar_lea.hbm %s1501_s16, 64  ;;  %s1188_s8 = scalar_lea.hbm %s1626_s6, 128 }
 0x18d   : > { %p1185_p8 = scmp.ne.s32.totalorder %s1501_s16, %s1184_s1  ;;  %p1189_p1 = scmp.lt.s32.totalorder %s1501_s16, %s1626_s6 }
 0x18e   : > { %p1190_p2 = scmp.lt.s32.totalorder %s1188_s8, %s1184_s1 }
 0x18f   : > { %p1186_p10 = pnand %p1185_p8, %p1409_p0 }
 0x190   : > { %p1191_p12 = por %p1190_p2, %p1189_p1 }
 0x191   : > { %p1187_p3 = pneg %p1186_p10 }
 0x193   : > { %p1192_p13 = pnand %p1191_p12, %p1187_p3 }
 0x195   : > { %1195 = shalt.err (!%p1192_p13)
}
 0x196   : > { %901 = dma.vmem_to_hbm [thread:$0]  (%p1409_p0), %s1503_s20, 64, %s1501_s16, %s1530_s21  }
 0x197 PF: > { %s654_s27 = sand.u32 1, %s1242_s24   ;;  %p1657_p5 = scmp.ge.s32.totalorder %s1262_s29, 2 }
 0x198   : > { %s655_s26 = scalar_lea.sflag [#allocation4], %s654_s27 }
 0x199   : > { %p919_p7 = pnand %p1657_p5, %p1363_p6 }
 0x19b   : > { %p920_p9 = pneg %p919_p7 }
 0x19d   : > { %1229 = dma.done.wait (%p920_p9), %s655_s26, 64  }
 0x19e   : > { %1231 = vsyncadd (%p920_p9), %s655_s26, 4294967232  ;;  %s1658_s22 = sadd.s32 4294967294, %s1262_s29  }
 0x19f   : > { %s663_s18 = sand.u32 1, %s1658_s22  }
 0x1a0   : > { %s664_s14 = scalar_lea.sflag [#allocation10], %s663_s18 }
 0x1a1   : > { %1233 = dma.done.wait (%p920_p9), %s664_s14, 128  }
 0x1a2   : > { %1235 = vsyncadd (%p920_p9), %s664_s14, 4294967168  ;;  %s682_s19 = scalar_lea.sflag [#allocation13], %s654_s27 }
 0x1a3   : > { %1237 = dma.done.wait (%p920_p9), %s682_s19, 64  }
 0x1a4   : > { %1239 = vsyncadd (%p920_p9), %s682_s19, 4294967232  ;;  %s31_s29 = sadd.s32 1, %s1262_s29   ;;  %s1659_s10 = sld [smem:[#allocation19_spill]] }
 0x1a5   : > { %p28_p0 = scmp.ge.s32.totalorder %s31_s29, 4   ;;  %s1660_s26 = sld [smem:[#allocation22_spill]] }
 0x1a6   : > { %s1661_s27 = sld [smem:[#allocation20_spill]]  ;;  %s1663_s24 = smov %s1246_s25 }
 0x1a7   : > { %s1662_s28 = sld [smem:[#allocation21_spill]]  ;;  %30 = sbr.rel (!%p28_p0) target bundleno = 16 (0x10), region = 138 }
 0x1aa   : > { %s1664_s25 = smov %s1659_s10 }
 0x1ac   :  { %687 = vsyncpa [#allocation3], 1 }
 0x1ad   :  { %689 = vsyncpa [#allocation3 + $0x1], 1 }
 0x1ae   :  { %690 = vsyncpa [#allocation6], 1 }
 0x1af   :  { %691 = vsyncpa [#allocation4], 1 }
 0x1b0   :  { %693 = vsyncpa [#allocation4 + $0x1], 1 }
 0x1b1   :  { %694 = vsyncpa [#allocation10], 1 }
 0x1b2   :  { %696 = vsyncpa [#allocation10 + $0x1], 1 }
 0x1b3   :  { %697 = vsyncpa [#allocation13], 1 }
 0x1b4   :  { %699 = vsyncpa [#allocation13 + $0x1], 1 }

</bundles_post_ra>
